<compile_context>
chip_gen: v7x
topology: tpu7x:2x2x1
jax: 0.10.0
libtpu: 0.0.40
codegen_flags: <defaults>
</compile_context>

<pallas_src>
import jax
import jax.numpy as jnp
from jax.experimental import pallas as pl
from jax.experimental.pallas import tpu as pltpu
import numpy as np

Ns = 11    # Hopper-v2 observation dim
Na = 3     # Hopper-v2 action dim
H1 = 400
H2 = 300

# Lane/sublane-friendly padded dims (multiples of 128 on the lane axis).
H1P = 512   # 400 -> 512
H2P = 384   # 300 -> 384 (3x128; do not pad further)
NAP = 128   # 3   -> 128 (lane-dense output store, sliced back in wrapper)


def _cdiv(a, b):
    return (a + b - 1) // b


def _round_up(n, m):
    return _cdiv(n, m) * m


def actor_kernel(x_ref, w1_ref, b1_ref, w2_ref, b2_ref, w3_ref, b3_ref, o_ref):
    """One batch tile of the fused 3-layer MLP. Weights/biases are VMEM-resident.

    Matmuls run in the weight dtype (bf16 on the default path, so activations
    are quantized too) with f32 accumulation; biases and the nonlinearities are
    applied in f32; the final store casts to o_ref.dtype.
    """
    wdt = w1_ref.dtype
    x = x_ref[...].astype(wdt)

    # fc1 + ReLU
    h1 = jnp.dot(x, w1_ref[...], preferred_element_type=jnp.float32) + b1_ref[...]
    h1 = jnp.maximum(h1, 0.0)

    # fc2 + ReLU
    h2 = jnp.dot(h1.astype(wdt), w2_ref[...],
                 preferred_element_type=jnp.float32) + b2_ref[...]
    h2 = jnp.maximum(h2, 0.0)

    # fc3 + tanh (padded output columns are tanh(0) = 0)
    h3 = jnp.dot(h2.astype(wdt), w3_ref[...],
                 preferred_element_type=jnp.float32) + b3_ref[...]
    o_ref[...] = jnp.tanh(h3).astype(o_ref.dtype)


def init_params(key, ipt=Ns, opt=Na, dis=0.003):
    """Deterministic init mirroring ActorNet.init_weight:
       fc1/fc2 weights ~ U(-1/sqrt(size[0]), +1/sqrt(size[0])) (size[0] = out_features,
       exactly as the reference fanin_init is written), fc3 weights ~ U(-dis, dis),
       biases use PyTorch Linear default U(-1/sqrt(in_features), +1/sqrt(in_features))."""
    ks = jax.random.split(key, 6)

    def u(k, shape, bound):
        return jax.random.uniform(k, shape, jnp.float32, -bound, bound)

    # PyTorch weight shape is (out, in); fanin_init uses size[0] = out.
    w1_t = u(ks[0], (H1, ipt), 1.0 / np.sqrt(H1))
    w2_t = u(ks[1], (H2, H1), 1.0 / np.sqrt(H2))
    w3_t = u(ks[2], (opt, H2), dis)
    b1 = u(ks[3], (1, H1), 1.0 / np.sqrt(ipt))
    b2 = u(ks[4], (1, H2), 1.0 / np.sqrt(H1))
    b3 = u(ks[5], (1, opt), 1.0 / np.sqrt(H2))

    # Transpose weights to (in, out) so the kernel does x @ W.
    return {
        "w1": w1_t.T, "b1": b1,
        "w2": w2_t.T, "b2": b2,
        "w3": w3_t.T, "b3": b3,
    }


def pad_params(params, weight_dtype=jnp.bfloat16):
    """Zero-pad weights/biases to lane-friendly padded dims (done once, outside
    the kernel).  Weights default to bf16 (half the weight-DMA bytes — this
    kernel is weight-DMA-bound on every TPU generation); biases stay f32.
    Pass weight_dtype=jnp.float32 for a bit-exact path."""
    def padw(w, rows, cols):
        out = jnp.zeros((rows, cols), weight_dtype)
        return out.at[: w.shape[0], : w.shape[1]].set(w.astype(weight_dtype))

    def padb(b, cols):
        out = jnp.zeros((1, cols), jnp.float32)
        return out.at[:, : b.shape[1]].set(b.astype(jnp.float32))

    return {
        "w1": padw(params["w1"], params["w1"].shape[0], H1P),
        "b1": padb(params["b1"], H1P),
        "w2": padw(params["w2"], H1P, H2P),
        "b2": padb(params["b2"], H2P),
        "w3": padw(params["w3"], H2P, NAP),
        "b3": padb(params["b3"], NAP),
    }


def _choose_tile_b(B, max_tile_b=1024):
    """Pick the batch tile:
       * tiny batches -> one grid step (no per-step overhead, no waste),
       * B >= 512     -> an even number of steps (v7x: both TensorCores active)
                         sized near max_tile_b with minimal B_pad waste."""
    B8 = _round_up(max(B, 1), 8)          # f32 sublane multiple
    if B8 < 512:
        return B8                          # single grid step
    if B8 <= max_tile_b:
        return _round_up(_cdiv(B8, 2), 8)  # exactly 2 steps
    n_steps = _round_up(_cdiv(B8, max_tile_b), 2)   # even step count
    return _round_up(_cdiv(B8, n_steps), 8)


def actor_forward(x, padded_params, max_tile_b=1024):
    """x: (B, Ns) float32.  padded_params: output of pad_params().
    Returns (B, Na) in the weight dtype (bf16 on the default path)."""
    B, ns = x.shape
    tile_b = _choose_tile_b(B, max_tile_b)
    B_pad = _round_up(B, tile_b)
    if B_pad != B:
        x = jnp.pad(x, ((0, B_pad - B), (0, 0)))

    p = padded_params
    w1, b1, w2, b2, w3, b3 = p["w1"], p["b1"], p["w2"], p["b2"], p["w3"], p["b3"]
    out_dtype = w1.dtype  # bf16 output on the default path halves writeback bytes

    # Weights/biases: constant index maps -> fetched once, VMEM-resident across
    # all batch tiles (footprint ~0.5 MB in bf16, far below VMEM limits).
    const2 = lambda i: (0, 0)

    out = pl.pallas_call(
        actor_kernel,
        out_shape=jax.ShapeDtypeStruct((B_pad, NAP), out_dtype),
        grid=(B_pad // tile_b,),
        in_specs=[
            pl.BlockSpec((tile_b, ns), lambda i: (i, 0)),
            pl.BlockSpec(w1.shape, const2),
            pl.BlockSpec(b1.shape, const2),
            pl.BlockSpec(w2.shape, const2),
            pl.BlockSpec(b2.shape, const2),
            pl.BlockSpec(w3.shape, const2),
            pl.BlockSpec(b3.shape, const2),
        ],
        out_specs=pl.BlockSpec((tile_b, NAP), lambda i: (i, 0)),
        compiler_params=pltpu.CompilerParams(
            dimension_semantics=("parallel",)),
    )(x, w1, b1, w2, b2, w3, b3)

    return out[:B, :Na]


def actor_forward_ref(x, p):
    """Pure-JAX reference on the original (unpadded, f32) params."""
    h1 = jnp.maximum(x @ p["w1"] + p["b1"], 0.0)
    h2 = jnp.maximum(h1 @ p["w2"] + p["b2"], 0.0)
    return jnp.tanh(h2 @ p["w3"] + p["b3"])


if __name__ == "__main__":
    key = jax.random.PRNGKey(0)
    kx, kp = jax.random.split(key)

    B = 2
    x = jax.random.normal(kx, (B, Ns), dtype=jnp.float32)
    params = init_params(kp)
    ref = actor_forward_ref(x, params)

    # f32 weight path: bit-exact agreement with the reference.
    out_f32 = jax.block_until_ready(actor_forward(x, pad_params(params, jnp.float32)))
    np.testing.assert_allclose(np.asarray(out_f32), np.asarray(ref),
                               rtol=1e-5, atol=1e-5)
    assert out_f32.shape == (B, Na)

    # Default (bf16 weights+activations, f32 accumulate) path: loose tolerance.
    bf16_params = pad_params(params)
    out_bf16 = jax.block_until_ready(actor_forward(x, bf16_params))
    np.testing.assert_allclose(np.asarray(out_bf16.astype(jnp.float32)),
                               np.asarray(ref), rtol=5e-2, atol=5e-2)

    # Larger batch exercises the multi-step grid (600 -> 2 tiles of 304 rows:
    # minimal padding waste, both v7x TensorCores engaged).
    xb = jax.random.normal(kx, (600, Ns), dtype=jnp.float32)
    ref_b = actor_forward_ref(xb, params)
    out_b32 = jax.block_until_ready(actor_forward(xb, pad_params(params, jnp.float32)))
    np.testing.assert_allclose(np.asarray(out_b32), np.asarray(ref_b),
                               rtol=1e-5, atol=1e-5)
    out_bb16 = jax.block_until_ready(actor_forward(xb, bf16_params))
    np.testing.assert_allclose(np.asarray(out_bb16.astype(jnp.float32)),
                               np.asarray(ref_b), rtol=5e-2, atol=5e-2)

    print("KERNEL_OK")
</pallas_src>

<mosaic_0001>
module attributes {stable_mosaic.version = 11 : i64} {
  func.func @actor_kernel(%arg0: i32, %arg1: memref<8x11xf32, #tpu.memory_space<vmem>>, %arg2: memref<11x512xf32, #tpu.memory_space<vmem>>, %arg3: memref<1x512xf32, #tpu.memory_space<vmem>>, %arg4: memref<512x384xf32, #tpu.memory_space<vmem>>, %arg5: memref<1x384xf32, #tpu.memory_space<vmem>>, %arg6: memref<384x128xf32, #tpu.memory_space<vmem>>, %arg7: memref<1x128xf32, #tpu.memory_space<vmem>>, %arg8: memref<8x128xf32, #tpu.memory_space<vmem>>) attributes {dimension_semantics = [#tpu.dimension_semantics<parallel>], iteration_bounds = array<i64: 1>, scalar_prefetch = 0 : i64, scratch_operands = 0 : i64, tpu.core_type = #tpu.core_type<tc>, window_params = [{transform_indices = @transform_0, window_bounds = array<i64: 8, 11>}, {pipeline_mode = #tpu.pipeline_mode<synchronous>, transform_indices = @transform_1, window_bounds = array<i64: 11, 512>}, {pipeline_mode = #tpu.pipeline_mode<synchronous>, transform_indices = @transform_2, window_bounds = array<i64: 1, 512>}, {pipeline_mode = #tpu.pipeline_mode<synchronous>, transform_indices = @transform_3, window_bounds = array<i64: 512, 384>}, {pipeline_mode = #tpu.pipeline_mode<synchronous>, transform_indices = @transform_4, window_bounds = array<i64: 1, 384>}, {pipeline_mode = #tpu.pipeline_mode<synchronous>, transform_indices = @transform_5, window_bounds = array<i64: 384, 128>}, {pipeline_mode = #tpu.pipeline_mode<synchronous>, transform_indices = @transform_6, window_bounds = array<i64: 1, 128>}, {transform_indices = @transform_7, window_bounds = array<i64: 8, 128>}]} {
    %c0 = arith.constant 0 : index
    %c0_0 = arith.constant 0 : index
    %0 = vector.load %arg1[%c0, %c0_0] : memref<8x11xf32, #tpu.memory_space<vmem>>, vector<8x11xf32>
    %c0_1 = arith.constant 0 : index
    %c0_2 = arith.constant 0 : index
    %1 = vector.load %arg2[%c0_1, %c0_2] : memref<11x512xf32, #tpu.memory_space<vmem>>, vector<11x512xf32>
    %cst = arith.constant dense<0.000000e+00> : vector<8x512xf32>
    %2 = tpu.matmul %0, %1, %cst {dimension_numbers = #tpu.dot_dimension_numbers<[1], [0], [0], [1], [0, 0, 1, 1], [], []>} : vector<8x11xf32>, vector<11x512xf32>, vector<8x512xf32> -> vector<8x512xf32>
    %c0_3 = arith.constant 0 : index
    %c0_4 = arith.constant 0 : index
    %3 = vector.load %arg3[%c0_3, %c0_4] : memref<1x512xf32, #tpu.memory_space<vmem>>, vector<1x512xf32>
    %4 = vector.broadcast %3 : vector<1x512xf32> to vector<8x512xf32>
    %5 = arith.addf %2, %4 : vector<8x512xf32>
    %cst_5 = arith.constant 0.000000e+00 : f32
    %6 = vector.broadcast %cst_5 : f32 to vector<8x512xf32>
    %7 = arith.maximumf %5, %6 : vector<8x512xf32>
    %c0_6 = arith.constant 0 : index
    %c0_7 = arith.constant 0 : index
    %8 = vector.load %arg4[%c0_6, %c0_7] : memref<512x384xf32, #tpu.memory_space<vmem>>, vector<512x384xf32>
    %cst_8 = arith.constant dense<0.000000e+00> : vector<8x384xf32>
    %9 = tpu.matmul %7, %8, %cst_8 {dimension_numbers = #tpu.dot_dimension_numbers<[1], [0], [0], [1], [0, 0, 1, 1], [], []>} : vector<8x512xf32>, vector<512x384xf32>, vector<8x384xf32> -> vector<8x384xf32>
    %c0_9 = arith.constant 0 : index
    %c0_10 = arith.constant 0 : index
    %10 = vector.load %arg5[%c0_9, %c0_10] : memref<1x384xf32, #tpu.memory_space<vmem>>, vector<1x384xf32>
    %11 = vector.broadcast %10 : vector<1x384xf32> to vector<8x384xf32>
    %12 = arith.addf %9, %11 : vector<8x384xf32>
    %cst_11 = arith.constant 0.000000e+00 : f32
    %13 = vector.broadcast %cst_11 : f32 to vector<8x384xf32>
    %14 = arith.maximumf %12, %13 : vector<8x384xf32>
    %c0_12 = arith.constant 0 : index
    %c0_13 = arith.constant 0 : index
    %15 = vector.load %arg6[%c0_12, %c0_13] : memref<384x128xf32, #tpu.memory_space<vmem>>, vector<384x128xf32>
    %cst_14 = arith.constant dense<0.000000e+00> : vector<8x128xf32>
    %16 = tpu.matmul %14, %15, %cst_14 {dimension_numbers = #tpu.dot_dimension_numbers<[1], [0], [0], [1], [0, 0, 1, 1], [], []>} : vector<8x384xf32>, vector<384x128xf32>, vector<8x128xf32> -> vector<8x128xf32>
    %c0_15 = arith.constant 0 : index
    %c0_16 = arith.constant 0 : index
    %17 = vector.load %arg7[%c0_15, %c0_16] : memref<1x128xf32, #tpu.memory_space<vmem>>, vector<1x128xf32>
    %18 = vector.broadcast %17 : vector<1x128xf32> to vector<8x128xf32>
    %19 = arith.addf %16, %18 : vector<8x128xf32>
    %20 = math.tanh %19 : vector<8x128xf32>
    %c0_17 = arith.constant 0 : index
    %c0_18 = arith.constant 0 : index
    %21 = vector.load %arg8[%c0_17, %c0_18] : memref<8x128xf32, #tpu.memory_space<vmem>>, vector<8x128xf32>
    tpu.vector_store %arg8[%c0_17, %c0_18], %20 {strides = array<i32>} : memref<8x128xf32, #tpu.memory_space<vmem>>, vector<8x128xf32>,
    return
  }
  func.func @transform_0(%arg0: i32) -> (i32, i32) {
    %c0_i32 = arith.constant 0 : i32
    %c0_i32_0 = arith.constant 0 : i32
    return %arg0, %c0_i32 : i32, i32
  }
  func.func @transform_1(%arg0: i32) -> (i32, i32) {
    %c0_i32 = arith.constant 0 : i32
    %c0_i32_0 = arith.constant 0 : i32
    %c0_i32_1 = arith.constant 0 : i32
    return %c0_i32, %c0_i32_0 : i32, i32
  }
  func.func @transform_2(%arg0: i32) -> (i32, i32) {
    %c0_i32 = arith.constant 0 : i32
    %c0_i32_0 = arith.constant 0 : i32
    %c0_i32_1 = arith.constant 0 : i32
    return %c0_i32, %c0_i32_0 : i32, i32
  }
  func.func @transform_3(%arg0: i32) -> (i32, i32) {
    %c0_i32 = arith.constant 0 : i32
    %c0_i32_0 = arith.constant 0 : i32
    %c0_i32_1 = arith.constant 0 : i32
    return %c0_i32, %c0_i32_0 : i32, i32
  }
  func.func @transform_4(%arg0: i32) -> (i32, i32) {
    %c0_i32 = arith.constant 0 : i32
    %c0_i32_0 = arith.constant 0 : i32
    %c0_i32_1 = arith.constant 0 : i32
    return %c0_i32, %c0_i32_0 : i32, i32
  }
  func.func @transform_5(%arg0: i32) -> (i32, i32) {
    %c0_i32 = arith.constant 0 : i32
    %c0_i32_0 = arith.constant 0 : i32
    %c0_i32_1 = arith.constant 0 : i32
    return %c0_i32, %c0_i32_0 : i32, i32
  }
  func.func @transform_6(%arg0: i32) -> (i32, i32) {
    %c0_i32 = arith.constant 0 : i32
    %c0_i32_0 = arith.constant 0 : i32
    %c0_i32_1 = arith.constant 0 : i32
    return %c0_i32, %c0_i32_0 : i32, i32
  }
  func.func @transform_7(%arg0: i32) -> (i32, i32) {
    %c0_i32 = arith.constant 0 : i32
    %c0_i32_0 = arith.constant 0 : i32
    return %arg0, %c0_i32 : i32, i32
  }
}

</mosaic_0001>

<bundles_post_ra>
// kernel: tpu_custom_call.1
= control target key start
LH: loop header
LB: loop body
LE: loop exit
PB: predicated region body
PF: predicated region fallthrough
CT: control target
= control target key end

     0   :  { %12 = vsyncpa [#allocation3], 0  ;;  %s1716_s0 = inlined_call_operand.hbm [shape: f32[8,11], index: 0, kind: input, shape index: {}]   ;;  %s1717_s1 = inlined_call_operand.hbm [shape: f32[11,512], index: 1, kind: input, shape index: {}]   ;;  %s1718_s2 = inlined_call_operand.vmem [shape: f32[1,512], index: 2, kind: input, shape index: {}]   ;;  %s1719_s3 = inlined_call_operand.hbm [shape: f32[512,384], index: 3, kind: input, shape index: {}]   ;;  %s1720_s4 = inlined_call_operand.vmem [shape: f32[1,384], index: 4, kind: input, shape index: {}]   ;;  %s1721_s5 = inlined_call_operand.hbm [shape: f32[384,128], index: 5, kind: input, shape index: {}]   ;;  %s1722_s6 = inlined_call_operand.vmem [shape: f32[1,128], index: 6, kind: input, shape index: {}]   ;;  %s1723_s7 = inlined_call_operand.hbm [shape: f32[8,128], index: 7, kind: output, shape index: {}]  }
   0x1   :  { %13 = vsyncpa [#allocation6], 0 }
   0x2   :  { %14 = vsyncpa [#allocation9], 0 }
   0x3   :  { %15 = vsyncpa [#allocation4], 0  ;;  %s1545_s24 = smov [#allocation5]   ;;  %s1427_s28 = scalar_lea.hbm %s1717_s1, 1024 }
   0x4   :  { %s31_s25 = sshll.u32 %s1545_s24, 4  ;;  %p1428_p0 = scmp.ne.s32.totalorder %s1717_s1, %s1427_s28  ;;  %s32_s25 = int_to_ptr.vmem [resolvable:$true] %s31_s25 }
   0x5   :  { %p1431_p1 = scmp.lt.u32.totalorder %s1427_s28, %s1717_s1 }
   0x7   :  { %p1433_p2 = pnand %p1431_p1, %p1428_p0 }
   0x9   :  { %1436 = shalt.err (!%p1433_p2)
}
   0xa   :  { %s1437_s10 = scalar_lea.vmem %s32_s25, 1024  ;;  %p1442_p4 = scmp.lt.s32.totalorder %s32_s25, %s32_s25 }
   0xb   :  { %p1438_p3 = scmp.ne.s32.totalorder %s32_s25, %s1437_s10  ;;  %p1443_p5 = scmp.lt.s32.totalorder %s1437_s10, %s1437_s10 }
   0xd   :  { %p1444_p6 = por %p1443_p5, %p1442_p4 }
   0xf   :  { %p1445_p7 = pnand %p1444_p6, %p1438_p3 }
  0x11   :  { %1448 = shalt.err (!%p1445_p7)
}
  0x12   :  { %s1546_s11 = smov 512   ;;  %s1547_s12 = smov 32  }
  0x13   :  { %37 = dma.hbm_to_vmem [thread:$0]  %s1717_s1, 1024, %s32_s25, [#allocation6], %s1546_s11, %s1546_s11, %s1547_s12  }
  0x14   :  { %s1548_s15 = smov [#allocation2]   ;;  %s1549_s17 = smov [#allocation7]  }
  0x15   :  { %s22_s16 = sshll.u32 %s1548_s15, 4  ;;  %s45_s18 = sshll.u32 %s1549_s17, 4  ;;  %s23_s16 = int_to_ptr.vmem [resolvable:$true] %s22_s16  ;;  %s46_s18 = int_to_ptr.vmem [resolvable:$true] %s45_s18 }
  0x16   :  { %s1449_s21 = scalar_lea.hbm %s1716_s0, 128 }
  0x17   :  { %p1450_p8 = scmp.ne.s32.totalorder %s1716_s0, %s1449_s21  ;;  %p1453_p9 = scmp.lt.u32.totalorder %s1449_s21, %s1716_s0 }
  0x19   :  { %p1455_p10 = pnand %p1453_p9, %p1450_p8 }
  0x1b   :  { %1458 = shalt.err (!%p1455_p10)
}
  0x1c   :  { %s1459_s1 = scalar_lea.vmem %s23_s16, 128  ;;  %p1464_p12 = scmp.lt.s32.totalorder %s23_s16, %s23_s16 }
  0x1d   :  { %p1460_p11 = scmp.ne.s32.totalorder %s23_s16, %s1459_s1  ;;  %p1465_p13 = scmp.lt.s32.totalorder %s1459_s1, %s1459_s1 }
  0x1f   :  { %p1466_p0 = por %p1465_p13, %p1464_p12 }
  0x21   :  { %p1467_p1 = pnand %p1466_p0, %p1460_p11 }
  0x23   :  { %1470 = shalt.err (!%p1467_p1)
}
  0x24   :  { %25 = dma.hbm_to_vmem [thread:$0]  %s1716_s0, 128, %s23_s16, [#allocation3]  }
  0x25   :  { %s1471_s30 = scalar_lea.hbm %s1719_s3, 24576 }
  0x26   :  { %p1472_p2 = scmp.ne.s32.totalorder %s1719_s3, %s1471_s30  ;;  %p1475_p3 = scmp.lt.u32.totalorder %s1471_s30, %s1719_s3 }
  0x28   :  { %p1477_p4 = pnand %p1475_p3, %p1472_p2 }
  0x2a   :  { %1480 = shalt.err (!%p1477_p4)
}
  0x2b   :  { %s1481_s12 = scalar_lea.vmem %s46_s18, 24576  ;;  %p1486_p6 = scmp.lt.s32.totalorder %s46_s18, %s46_s18 }
  0x2c   :  { %p1482_p5 = scmp.ne.s32.totalorder %s46_s18, %s1481_s12  ;;  %p1487_p7 = scmp.lt.s32.totalorder %s1481_s12, %s1481_s12 }
  0x2e   :  { %p1488_p8 = por %p1487_p7, %p1486_p6 }
  0x30   :  { %p1489_p9 = pnand %p1488_p8, %p1482_p5 }
  0x32   :  { %1492 = shalt.err (!%p1489_p9)
}
  0x33   :  { %s1550_s0 = smov 384   ;;  %s1551_s13 = smov 24  }
  0x34   :  { %51 = dma.hbm_to_vmem [thread:$0]  %s1719_s3, 24576, %s46_s18, [#allocation6], %s1550_s0, %s1550_s0, %s1551_s13  }
  0x35   :  { %s1552_s16 = smov [#allocation8]   ;;  %s1493_s21 = scalar_lea.hbm %s1721_s5, 6144 }
  0x36   :  { %s59_s17 = sshll.u32 %s1552_s16, 4  ;;  %p1494_p10 = scmp.ne.s32.totalorder %s1721_s5, %s1493_s21  ;;  %s60_s17 = int_to_ptr.vmem [resolvable:$true] %s59_s17 }
  0x37   :  { %p1497_p11 = scmp.lt.u32.totalorder %s1493_s21, %s1721_s5 }
  0x39   :  { %p1499_p12 = pnand %p1497_p11, %p1494_p10 }
  0x3b   :  { %1502 = shalt.err (!%p1499_p12)
}
  0x3c   :  { %s1503_s1 = scalar_lea.vmem %s60_s17, 6144  ;;  %p1508_p0 = scmp.lt.s32.totalorder %s60_s17, %s60_s17 }
  0x3d   :  { %p1504_p13 = scmp.ne.s32.totalorder %s60_s17, %s1503_s1  ;;  %p1509_p1 = scmp.lt.s32.totalorder %s1503_s1, %s1503_s1 }
  0x3f   :  { %p1510_p2 = por %p1509_p1, %p1508_p0 }
  0x41   :  { %p1511_p3 = pnand %p1510_p2, %p1504_p13 }
  0x43   :  { %1514 = shalt.err (!%p1511_p3)
}
  0x44   :  { %s1553_s3 = smov 128   ;;  %s1554_s18 = smov 8  }
  0x45   :  { %65 = dma.hbm_to_vmem [thread:$0]  %s1721_s5, 6144, %s60_s17, [#allocation9], %s1553_s3, %s1553_s3, %s1554_s18  }
  0x46   :  { %1537 = dma.done.wait [#allocation3], 128  }
  0x47   :  { %1538 = vsyncadd [#allocation3], 4294967168 }
  0x48   :  { %1539 = dma.done.wait [#allocation6], 25600  }
  0x49   :  { %1540 = vsyncadd [#allocation6], 4294941696 }
  0x4a   :  { %1541 = dma.done.wait [#allocation9], 6144  }
  0x4b   :  { %1542 = vsyncadd [#allocation9], 4294961152  ;;  %v1555_v0 = vmov 0.0   ;;  %vm115_vm0 = vcmask 1042432   ;;  %vm1556_vm1 = vmmov 1   ;;  %v82_v2 = vld [vmem:[#allocation5 + $0x8] sm:$0xff] }
  0x4c   :  { %192 = vmatprep.mubr.f32.mxu0 %v1555_v0  ;;  %263 = vmatprep.mubr.f32.mxu1 %v1555_v0  ;;  %vm1650_vm2 = vmpackc.low %vm115_vm0, %vm1556_vm1  ;;  %v86_v3 = vld [vmem:[#allocation5 + $0x28] sm:$0x7]  ;;  %v81_v4 = vld [vmem:[#allocation5] sm:$0xff]  ;;  %vm111_vm3 = vcmask 89088   ;;  %vm1558_vm4 = vmmov 0   ;;  %s1559_s8 = smov [#allocation10]  }
  0x4d   :  { %v1146_v5 = vpack.c.bf16 %v86_v3, %v82_v2  ;;  %v85_v6 = vld [vmem:[#allocation5 + $0x20] sm:$0x7]  ;;  %v84_v7 = vld [vmem:[#allocation5 + $0x18] sm:$0xff]  ;;  %v83_v11 = vld [vmem:[#allocation5 + $0x10] sm:$0xff]  ;;  %s971_s9 = sshll.u32 %s1559_s8, 4  ;;  %s972_s9 = int_to_ptr.vmem [resolvable:$true] %s971_s9 }
  0x4e   :  { %v1149_v8 = vpack.c.bf16 %v85_v6, %v81_v4  ;;  %v80_v9 = vld [vmem:[#allocation2] sm:$0xff]  ;;  %v87_v12 = vld [vmem:[#allocation5 + $0x30] sm:$0x7]  ;;  %v275_v15 = vld [vmem:[#allocation7 + $0x8] sm:$0xff]  ;;  %s1515_s10 = scalar_lea.vmem %s972_s9, 128  ;;  %p1520_p5 = scmp.lt.s32.totalorder %s972_s9, %s972_s9 }
  0x4f   :  { %v88_v10 = vld [vmem:[#allocation5 + $0x38] sm:$0x7]  ;;  %1148 = vmatprep.subr.msk.bf16.mxu0 %vm1650_vm2, %v1146_v5  ;;  %v1155_v14 = vpack.c.bf16 %v87_v12, %v83_v11  ;;  %v278_v16 = vld [vmem:[#allocation7 + $0x20] sm:$0xff]  ;;  %v284_v21 = vld [vmem:[#allocation7 + $0x50] sm:$0xff]  ;;  %p1516_p4 = scmp.ne.s32.totalorder %s972_s9, %s1515_s10  ;;  %p1521_p6 = scmp.lt.s32.totalorder %s1515_s10, %s1515_s10 }
  0x50   :  { %v1152_v13 = vpack.c.bf16 %v88_v10, %v84_v7  ;;  %v274_v17 = vld [vmem:[#allocation7] sm:$0xff]  ;;  %1151 = vmatpush1.bf16.msk.msra.mxu0 %vm1650_vm2, %v1149_v8  ;;  %v1158_v18 = vpack.c.bf16 %v278_v16, %v275_v15  ;;  %v277_v19 = vld [vmem:[#allocation7 + $0x18] sm:$0xff]  ;;  %v280_v24 = vld [vmem:[#allocation7 + $0x30] sm:$0xff] }
  0x51   :  { %v281_v20 = vld [vmem:[#allocation7 + $0x38] sm:$0xff]  ;;  %v1160_v22 = vpack.c.bf16 %v277_v19, %v274_v17  ;;  %v283_v25 = vld [vmem:[#allocation7 + $0x48] sm:$0xff]  ;;  %v290_v27 = vld [vmem:[#allocation7 + $0x80] sm:$0xff]  ;;  %p1522_p7 = por %p1521_p6, %p1520_p5 }
  0x52   :  { %1154 = vmatprep.subr.msk.bf16.mxu1 %vm1650_vm2, %v1152_v13  ;;  %v1162_v23 = vpack.c.bf16 %v284_v21, %v281_v20  ;;  %1159 = vmatprep.subr.bf16.mxu0 %v1158_v18  ;;  %v287_v26 = vld [vmem:[#allocation7 + $0x68] sm:$0xff]  ;;  %v1164_v28 = vpack.c.bf16 %v283_v25, %v280_v24  ;;  %v286_v30 = vld [vmem:[#allocation7 + $0x60] sm:$0xff]  ;;  %v289_v31 = vld [vmem:[#allocation7 + $0x78] sm:$0xff] }
  0x53   :  { %1157 = vmatpush1.bf16.msk.msra.mxu1 %vm1650_vm2, %v1155_v14  ;;  %984 = vmatmul.mubr.msk.f32.vlgmr.msra.gmra.mrb[0].mxu0 %vm111_vm3, %v80_v9  ;;  %v1166_v29 = vpack.c.bf16 %v290_v27, %v287_v26  ;;  %v293_v32 = vld [vmem:[#allocation7 + $0x98] sm:$0xff]  ;;  %v296_v33 = vld [vmem:[#allocation7 + $0xb0] sm:$0xff]  ;;  %v1168_v34 = vpack.c.bf16 %v289_v31, %v286_v30  ;;  %v295_v37 = vld [vmem:[#allocation7 + $0xa8] sm:$0xff]  ;;  %p1523_p8 = pnand %p1522_p7, %p1516_p4 }
  0x54   :  { %1161 = vmatpush1.bf16.msra.mxu0 %v1160_v22  ;;  %v1170_v35 = vpack.c.bf16 %v296_v33, %v293_v32  ;;  %v292_v36 = vld [vmem:[#allocation7 + $0x90] sm:$0xff]  ;;  %v299_v38 = vld [vmem:[#allocation7 + $0xc8] sm:$0xff]  ;;  %v302_v39 = vld [vmem:[#allocation7 + $0xe0] sm:$0xff] }
  0x55   :  { %1163 = vmatprep.subr.bf16.mxu0 %v1162_v23  ;;  %v324_v40 = vld [vmem:[#allocation7 + $0x190] sm:$0xff]  ;;  %v327_v41 = vld [vmem:[#allocation7 + $0x1a8] sm:$0xff]  ;;  %v1172_v44 = vpack.c.bf16 %v295_v37, %v292_v36  ;;  %v298_v45 = vld [vmem:[#allocation7 + $0xc0] sm:$0xff]  ;;  %v1174_v48 = vpack.c.bf16 %v302_v39, %v299_v38 }
  0x56   :  { %987 = vmatmul.mubr.msk.f32.vlgmr.msra.gmra.mrb[0].mxu1 %vm111_vm3, %v80_v9  ;;  %v1286_v42 = vpack.c.bf16 %v327_v41, %v324_v40  ;;  %v276_v43 = vld [vmem:[#allocation7 + $0x10] sm:$0xff]  ;;  %v301_v46 = vld [vmem:[#allocation7 + $0xd8] sm:$0xff]  ;;  %v279_v47 = vld [vmem:[#allocation7 + $0x28] sm:$0xff] }
  0x57   :  { %v305_v49 = vld [vmem:[#allocation7 + $0xf8] sm:$0xff]  ;;  %v1288_v50 = vpack.c.bf16 %v279_v47, %v276_v43  ;;  %v330_v51 = vld [vmem:[#allocation7 + $0x1c0] sm:$0xff]  ;;  %v308_v53 = vld [vmem:[#allocation7 + $0x110] sm:$0xff]  ;;  %v1176_v59 = vpack.c.bf16 %v301_v46, %v298_v45 }
  0x58   :  { %1165 = vmatpush1.bf16.msra.mxu0 %v1164_v28  ;;  %1287 = vmatprep.subr.bf16.mxu1 %v1286_v42  ;;  %v333_v52 = vld [vmem:[#allocation7 + $0x1d8] sm:$0xff]  ;;  %v282_v55 = vld [vmem:[#allocation7 + $0x40] sm:$0xff]  ;;  %v336_v58 = vld [vmem:[#allocation7 + $0x1f0] sm:$0xff]  ;;  %v1178_v63 = vpack.c.bf16 %v308_v53, %v305_v49 }
  0x59   :  { %1167 = vmatprep.subr.bf16.mxu0 %v1166_v29  ;;  %v1290_v54 = vpack.c.bf16 %v333_v52, %v330_v51  ;;  %v285_v56 = vld [vmem:[#allocation7 + $0x58] sm:$0xff]  ;;  %1289 = vmatpush3.bf16.msra.mxu1 %v1288_v50  ;;  %v304_v60 = vld [vmem:[#allocation7 + $0xf0] sm:$0xff]  ;;  %v307_v61 = vld [vmem:[#allocation7 + $0x108] sm:$0xff] }
  0x5a   :  { %v1292_v57 = vpack.c.bf16 %v285_v56, %v282_v55  ;;  %v339_v62 = vld [vmem:[#allocation7 + $0x208] sm:$0xff]  ;;  %v288_v3 = vld [vmem:[#allocation7 + $0x70] sm:$0xff]  ;;  %v314_v5 = vld [vmem:[#allocation7 + $0x140] sm:$0xff]  ;;  %v1180_v9 = vpack.c.bf16 %v307_v61, %v304_v60 }
  0x5b   :  { %1291 = vmatprep.subr.bf16.mxu1 %v1290_v54  ;;  %v311_v1 = vld [vmem:[#allocation7 + $0x128] sm:$0xff]  ;;  %v1294_v2 = vpack.c.bf16 %v339_v62, %v336_v58  ;;  %v342_v6 = vld [vmem:[#allocation7 + $0x220] sm:$0xff]  ;;  %v345_v7 = vld [vmem:[#allocation7 + $0x238] sm:$0xff] }
  0x5c   :  { %1169 = vmatpush1.bf16.msra.mxu0 %v1168_v34  ;;  %v291_v4 = vld [vmem:[#allocation7 + $0x88] sm:$0xff]  ;;  %v310_v10 = vld [vmem:[#allocation7 + $0x120] sm:$0xff]  ;;  %v1298_v11 = vpack.c.bf16 %v345_v7, %v342_v6  ;;  %v297_v13 = vld [vmem:[#allocation7 + $0xb8] sm:$0xff]  ;;  %v1182_v14 = vpack.c.bf16 %v314_v5, %v311_v1 }
  0x5d   :  { %1171 = vmatprep.subr.bf16.mxu0 %v1170_v35  ;;  %1293 = vmatpush3.bf16.msra.mxu1 %v1292_v57  ;;  %v1296_v8 = vpack.c.bf16 %v291_v4, %v288_v3  ;;  %v294_v12 = vld [vmem:[#allocation7 + $0xa0] sm:$0xff]  ;;  %v313_v15 = vld [vmem:[#allocation7 + $0x138] sm:$0xff]  ;;  %v348_v16 = vld [vmem:[#allocation7 + $0x250] sm:$0xff] }
  0x5e   :  { %1295 = vmatprep.subr.bf16.mxu1 %v1294_v2  ;;  %v351_v17 = vld [vmem:[#allocation7 + $0x268] sm:$0xff]  ;;  %v317_v18 = vld [vmem:[#allocation7 + $0x158] sm:$0xff]  ;;  %v320_v19 = vld [vmem:[#allocation7 + $0x170] sm:$0xff]  ;;  %v1300_v20 = vpack.c.bf16 %v297_v13, %v294_v12  ;;  %v1184_v21 = vpack.c.bf16 %v313_v15, %v310_v10 }
  0x5f   :  { %v316_v22 = vld [vmem:[#allocation7 + $0x150] sm:$0xff]  ;;  %v1302_v23 = vpack.c.bf16 %v351_v17, %v348_v16  ;;  %v303_v25 = vld [vmem:[#allocation7 + $0xe8] sm:$0xff]  ;;  %v1186_v26 = vpack.c.bf16 %v320_v19, %v317_v18  ;;  %v354_v28 = vld [vmem:[#allocation7 + $0x280] sm:$0xff] }
  0x60   :  { %1173 = vmatpush1.bf16.msra.mxu0 %v1172_v44  ;;  %v300_v24 = vld [vmem:[#allocation7 + $0xd0] sm:$0xff]  ;;  %v319_v27 = vld [vmem:[#allocation7 + $0x168] sm:$0xff]  ;;  %v357_v29 = vld [vmem:[#allocation7 + $0x298] sm:$0xff] }
  0x61   :  { %1175 = vmatprep.subr.bf16.mxu0 %v1174_v48  ;;  %1297 = vmatpush3.bf16.msra.mxu1 %v1296_v8  ;;  %v323_v30 = vld [vmem:[#allocation7 + $0x188] sm:$0xff]  ;;  %v326_v31 = vld [vmem:[#allocation7 + $0x1a0] sm:$0xff]  ;;  %v1304_v32 = vpack.c.bf16 %v303_v25, %v300_v24  ;;  %v1188_v33 = vpack.c.bf16 %v319_v27, %v316_v22  ;;  %v1306_v35 = vpack.c.bf16 %v357_v29, %v354_v28  ;;  %v309_v37 = vld [vmem:[#allocation7 + $0x118] sm:$0xff] }
  0x62   :  { %1299 = vmatprep.subr.bf16.mxu1 %v1298_v11  ;;  %v322_v34 = vld [vmem:[#allocation7 + $0x180] sm:$0xff]  ;;  %v1190_v38 = vpack.c.bf16 %v326_v31, %v323_v30  ;;  %v325_v39 = vld [vmem:[#allocation7 + $0x198] sm:$0xff]  ;;  %v360_v40 = vld [vmem:[#allocation7 + $0x2b0] sm:$0xff] }
  0x63   :  { %v306_v36 = vld [vmem:[#allocation7 + $0x100] sm:$0xff]  ;;  %v363_v41 = vld [vmem:[#allocation7 + $0x2c8] sm:$0xff]  ;;  %v329_v42 = vld [vmem:[#allocation7 + $0x1b8] sm:$0xff]  ;;  %v1192_v45 = vpack.c.bf16 %v325_v39, %v322_v34  ;;  %v91_v39 = vlaneseq }
  0x64   :  { %1177 = vmatpush1.bf16.msra.mxu0 %v1176_v59  ;;  %v332_v43 = vld [vmem:[#allocation7 + $0x1d0] sm:$0xff]  ;;  %v1308_v44 = vpack.c.bf16 %v309_v37, %v306_v36  ;;  %v1310_v46 = vpack.c.bf16 %v363_v41, %v360_v40  ;;  %v315_v48 = vld [vmem:[#allocation7 + $0x148] sm:$0xff]  ;;  %v338_v53 = vld [vmem:[#allocation7 + $0x200] sm:$0xff] }
  0x65   :  { %1179 = vmatprep.subr.bf16.mxu0 %v1178_v63  ;;  %1301 = vmatpush3.bf16.msra.mxu1 %v1300_v20  ;;  %v312_v47 = vld [vmem:[#allocation7 + $0x130] sm:$0xff]  ;;  %v1194_v49 = vpack.c.bf16 %v332_v43, %v329_v42  ;;  %v331_v51 = vld [vmem:[#allocation7 + $0x1c8] sm:$0xff]  ;;  %v334_v57 = vld [vmem:[#allocation7 + $0x1e0] sm:$0xff]  ;;  %v1664_v40 = vshrl.u32 %v91_v39, 7 }
  0x66   :  { %1303 = vmatprep.subr.bf16.mxu1 %v1302_v23  ;;  %v328_v50 = vld [vmem:[#allocation7 + $0x1b0] sm:$0xff]  ;;  %v335_v52 = vld [vmem:[#allocation7 + $0x1e8] sm:$0xff]  ;;  %v1312_v54 = vpack.c.bf16 %v315_v48, %v312_v47  ;;  %v337_v58 = vld [vmem:[#allocation7 + $0x1f8] sm:$0xff] }
  0x67   :  { %v1196_v55 = vpack.c.bf16 %v331_v51, %v328_v50  ;;  %v1198_v56 = vpack.c.bf16 %v338_v53, %v335_v52  ;;  %v341_v59 = vld [vmem:[#allocation7 + $0x218] sm:$0xff]  ;;  %v344_v60 = vld [vmem:[#allocation7 + $0x230] sm:$0xff]  ;;  %v1200_v61 = vpack.c.bf16 %v337_v58, %v334_v57  ;;  %v343_v1 = vld [vmem:[#allocation7 + $0x228] sm:$0xff]  ;;  %v93_v41 = vsub.s32 0, %v1664_v40 }
  0x68   :  { %1181 = vmatpush1.bf16.msra.mxu0 %v1180_v9  ;;  %v1202_v62 = vpack.c.bf16 %v344_v60, %v341_v59  ;;  %v340_v63 = vld [vmem:[#allocation7 + $0x210] sm:$0xff]  ;;  %v347_v2 = vld [vmem:[#allocation7 + $0x248] sm:$0xff]  ;;  %v350_v3 = vld [vmem:[#allocation7 + $0x260] sm:$0xff]  ;;  %v97_v43 = vsub.s32 1, %v1664_v40 }
  0x69   :  { %1183 = vmatprep.subr.bf16.mxu0 %v1182_v14  ;;  %1305 = vmatpush3.bf16.msra.mxu1 %v1304_v32  ;;  %v1204_v4 = vpack.c.bf16 %v343_v1, %v340_v63  ;;  %v1206_v5 = vpack.c.bf16 %v350_v3, %v347_v2  ;;  %v346_v6 = vld [vmem:[#allocation7 + $0x240] sm:$0xff]  ;;  %v349_v7 = vld [vmem:[#allocation7 + $0x258] sm:$0xff]  ;;  %v356_v9 = vld [vmem:[#allocation7 + $0x290] sm:$0xff] }
  0x6a   :  { %1307 = vmatprep.subr.bf16.mxu1 %v1306_v35  ;;  %v353_v8 = vld [vmem:[#allocation7 + $0x278] sm:$0xff]  ;;  %v1208_v10 = vpack.c.bf16 %v349_v7, %v346_v6  ;;  %v352_v12 = vld [vmem:[#allocation7 + $0x270] sm:$0xff]  ;;  %v355_v13 = vld [vmem:[#allocation7 + $0x288] sm:$0xff] }
  0x6b   :  { %v1210_v11 = vpack.c.bf16 %v356_v9, %v353_v8  ;;  %v359_v14 = vld [vmem:[#allocation7 + $0x2a8] sm:$0xff]  ;;  %v362_v15 = vld [vmem:[#allocation7 + $0x2c0] sm:$0xff]  ;;  %v1212_v16 = vpack.c.bf16 %v355_v13, %v352_v12  ;;  %v361_v19 = vld [vmem:[#allocation7 + $0x2b8] sm:$0xff] }
  0x6c   :  { %1185 = vmatpush1.bf16.msra.mxu0 %v1184_v21  ;;  %v1214_v17 = vpack.c.bf16 %v362_v15, %v359_v14  ;;  %v358_v18 = vld [vmem:[#allocation7 + $0x2a0] sm:$0xff]  ;;  %v365_v21 = vld [vmem:[#allocation7 + $0x2d8] sm:$0xff]  ;;  %v368_v22 = vld [vmem:[#allocation7 + $0x2f0] sm:$0xff] }
  0x6d   :  { %1187 = vmatprep.subr.bf16.mxu0 %v1186_v26  ;;  %1309 = vmatpush3.bf16.msra.mxu1 %v1308_v44  ;;  %v1216_v20 = vpack.c.bf16 %v361_v19, %v358_v18  ;;  %v366_v23 = vld [vmem:[#allocation7 + $0x2e0] sm:$0xff]  ;;  %v1218_v24 = vpack.c.bf16 %v368_v22, %v365_v21  ;;  %v369_v25 = vld [vmem:[#allocation7 + $0x2f8] sm:$0xff]  ;;  %v364_v26 = vld [vmem:[#allocation7 + $0x2d0] sm:$0xff]  ;;  %v105_v44 = vsub.s32 3, %v1664_v40 }
  0x6e   :  { %1311 = vmatprep.subr.bf16.mxu1 %v1310_v46  ;;  %v367_v27 = vld [vmem:[#allocation7 + $0x2e8] sm:$0xff]  ;;  %v1314_v28 = vpack.c.bf16 %v369_v25, %v366_v23  ;;  %v318_v30 = vld [vmem:[#allocation7 + $0x160] sm:$0xff]  ;;  %v321_v31 = vld [vmem:[#allocation7 + $0x178] sm:$0xff] }
  0x6f   :  { %v1220_v29 = vpack.c.bf16 %v367_v27, %v364_v26  ;;  %v1316_v32 = vpack.c.bf16 %v321_v31, %v318_v30  ;;  %v374_v34 = vld [vmem:[#allocation7 + $0x320] sm:$0xff]  ;;  %v420_v35 = vld [vmem:[#allocation7 + $0x490] sm:$0xff]  ;;  %v423_v37 = vld [vmem:[#allocation7 + $0x4a8] sm:$0xff] }
  0x70   :  { %1189 = vmatpush1.bf16.msra.mxu0 %v1188_v33  ;;  %v371_v33 = vld [vmem:[#allocation7 + $0x308] sm:$0xff]  ;;  %v1670_v42 = vld [vmem:[%s1718_s2] sm:$0xf]  ;;  %v370_v48 = vld [vmem:[#allocation7 + $0x300] sm:$0xff] }
  0x71   :  { %1191 = vmatprep.subr.bf16.mxu0 %v1190_v38  ;;  %1313 = vmatpush3.bf16.msra.mxu1 %v1312_v54  ;;  %v1222_v36 = vpack.c.bf16 %v374_v34, %v371_v33  ;;  %v1318_v38 = vpack.c.bf16 %v423_v37, %v420_v35  ;;  %v98_v46 = vrot.slane %v1670_v42, %v97_v43  ;;  %v372_v53 = vld [vmem:[#allocation7 + $0x310] sm:$0xff]  ;;  %v375_v54 = vld [vmem:[#allocation7 + $0x328] sm:$0xff]  ;;  %v426_v58 = vld [vmem:[#allocation7 + $0x4c0] sm:$0xff] }
  0x72   :  { %1315 = vmatprep.subr.bf16.mxu1 %v1314_v28  ;;  %v106_v50 = vrot.slane %v1670_v42, %v105_v44  ;;  %v380_v57 = vld [vmem:[#allocation7 + $0x350] sm:$0xff]  ;;  %v429_v59 = vld [vmem:[#allocation7 + $0x4d8] sm:$0xff]  ;;  %v1320_v1 = vpack.c.bf16 %v375_v54, %v372_v53  ;;  %v379_v3 = vld [vmem:[#allocation7 + $0x348] sm:$0xff] }
  0x73   :  { %v376_v2 = vld [vmem:[#allocation7 + $0x330] sm:$0xff]  ;;  %v1322_v7 = vpack.c.bf16 %v429_v59, %v426_v58  ;;  %v378_v8 = vld [vmem:[#allocation7 + $0x340] sm:$0xff]  ;;  %v381_v9 = vld [vmem:[#allocation7 + $0x358] sm:$0xff] }
  0x74   :  { %1193 = vmatpush1.bf16.msra.mxu0 %v1192_v45  ;;  %v94_v45 = vrot.slane %v1670_v42, %v93_v41  ;;  %v432_v12 = vld [vmem:[#allocation7 + $0x4f0] sm:$0xff]  ;;  %v435_v13 = vld [vmem:[#allocation7 + $0x508] sm:$0xff]  ;;  %v1228_v15 = vpack.c.bf16 %v379_v3, %v376_v2  ;;  %v385_v18 = vld [vmem:[#allocation7 + $0x378] sm:$0xff] }
  0x75   :  { %1195 = vmatprep.subr.bf16.mxu0 %v1194_v49  ;;  %1317 = vmatpush3.bf16.msra.mxu1 %v1316_v32  ;;  %v373_v49 = vld [vmem:[#allocation7 + $0x318] sm:$0xff]  ;;  %v384_v21 = vld [vmem:[#allocation7 + $0x370] sm:$0xff]  ;;  %v387_v22 = vld [vmem:[#allocation7 + $0x388] sm:$0xff] }
  0x76   :  { %1319 = vmatprep.subr.bf16.mxu1 %v1318_v38  ;;  %v1224_v63 = vpack.c.bf16 %v373_v49, %v370_v48  ;;  %v389_v23 = vld [vmem:[#allocation7 + $0x398] sm:$0xff]  ;;  %v438_v25 = vld [vmem:[#allocation7 + $0x520] sm:$0xff]  ;;  %v1328_v28 = vpack.c.bf16 %v387_v22, %v384_v21  ;;  %v391_v30 = vld [vmem:[#allocation7 + $0x3a8] sm:$0xff] }
  0x77   :  { %v441_v26 = vld [vmem:[#allocation7 + $0x538] sm:$0xff]  ;;  %v390_v33 = vld [vmem:[#allocation7 + $0x3a0] sm:$0xff]  ;;  %v395_v35 = vld [vmem:[#allocation7 + $0x3c8] sm:$0xff] }
  0x78   :  { %1197 = vmatpush1.bf16.msra.mxu0 %v1196_v55  ;;  %v377_v55 = vld [vmem:[#allocation7 + $0x338] sm:$0xff]  ;;  %v1330_v32 = vpack.c.bf16 %v441_v26, %v438_v25  ;;  %v444_v37 = vld [vmem:[#allocation7 + $0x550] sm:$0xff]  ;;  %v447_v38 = vld [vmem:[#allocation7 + $0x568] sm:$0xff] }
  0x79   :  { %1199 = vmatprep.subr.bf16.mxu0 %v1198_v56  ;;  %v1226_v6 = vpack.c.bf16 %v380_v57, %v377_v55  ;;  %v393_v34 = vld [vmem:[#allocation7 + $0x3b8] sm:$0xff]  ;;  %v1334_v48 = vpack.c.bf16 %v447_v38, %v444_v37  ;;  %v396_v49 = vld [vmem:[#allocation7 + $0x3d0] sm:$0xff]  ;;  %v450_v53 = vld [vmem:[#allocation7 + $0x580] sm:$0xff] }
  0x7a   :  { %v1332_v44 = vpack.c.bf16 %v393_v34, %v390_v33  ;;  %v453_v54 = vld [vmem:[#allocation7 + $0x598] sm:$0xff]  ;;  %v400_v57 = vld [vmem:[#allocation7 + $0x3f0] sm:$0xff]  ;;  %v403_v58 = vld [vmem:[#allocation7 + $0x408] sm:$0xff] }
  0x7b   :  { %v410_v2 = vld [vmem:[#allocation7 + $0x440] sm:$0xff]  ;;  %v456_v3 = vld [vmem:[#allocation7 + $0x5b0] sm:$0xff]  ;;  %v417_v26 = vld [vmem:[#allocation7 + $0x478] sm:$0xff] }
  0x7c   :  { %1201 = vmatpush1.bf16.msra.mxu0 %v1200_v61  ;;  %v412_v21 = vld [vmem:[#allocation7 + $0x450] sm:$0xff]  ;;  %v414_v25 = vld [vmem:[#allocation7 + $0x460] sm:$0xff]  ;;  %v421_v33 = vld [vmem:[#allocation7 + $0x498] sm:$0xff] }
  0x7d   :  { %1203 = vmatprep.subr.bf16.mxu0 %v1202_v62  ;;  %v425_v34 = vld [vmem:[#allocation7 + $0x4b8] sm:$0xff] }
  0x80   :  { %1205 = vmatpush1.bf16.msra.mxu0 %v1204_v4 }
  0x81   :  { %1207 = vmatprep.subr.bf16.mxu0 %v1206_v5 }
  0x84   :  { %1209 = vmatpush1.bf16.msra.mxu0 %v1208_v10  ;;  %v383_v10 = vld [vmem:[#allocation7 + $0x368] sm:$0xff] }
  0x85   :  { %1211 = vmatprep.subr.bf16.mxu0 %v1210_v11  ;;  %v386_v11 = vld [vmem:[#allocation7 + $0x380] sm:$0xff] }
  0x86   :  { %v1230_v19 = vpack.c.bf16 %v386_v11, %v383_v10 }
  0x88   :  { %1213 = vmatpush1.bf16.msra.mxu0 %v1212_v16  ;;  %v1324_v16 = vpack.c.bf16 %v381_v9, %v378_v8  ;;  %v406_v8 = vld [vmem:[#allocation7 + $0x420] sm:$0xff]  ;;  %v409_v9 = vld [vmem:[#allocation7 + $0x438] sm:$0xff] }
  0x89   :  { %1215 = vmatprep.subr.bf16.mxu0 %v1214_v17  ;;  %v382_v17 = vld [vmem:[#allocation7 + $0x360] sm:$0xff] }
  0x8a   :  { %v1232_v27 = vpack.c.bf16 %v385_v18, %v382_v17  ;;  %v465_v17 = vld [vmem:[#allocation7 + $0x5f8] sm:$0xff] }
  0x8c   :  { %1217 = vmatpush1.bf16.msra.mxu0 %v1216_v20  ;;  %v1326_v20 = vpack.c.bf16 %v435_v13, %v432_v12  ;;  %v408_v12 = vld [vmem:[#allocation7 + $0x430] sm:$0xff]  ;;  %v411_v13 = vld [vmem:[#allocation7 + $0x448] sm:$0xff] }
  0x8d   :  { %1219 = vmatprep.subr.bf16.mxu0 %v1218_v24  ;;  %v392_v24 = vld [vmem:[#allocation7 + $0x3b0] sm:$0xff] }
  0x8e   :  { %v1234_v31 = vpack.c.bf16 %v392_v24, %v389_v23  ;;  %v415_v24 = vld [vmem:[#allocation7 + $0x468] sm:$0xff] }
  0x90   :  { %1221 = vmatpush1.bf16.msra.mxu0 %v1220_v29  ;;  %v388_v29 = vld [vmem:[#allocation7 + $0x390] sm:$0xff] }
  0x91   :  { %1223 = vmatprep.subr.bf16.mxu0 %v1222_v36  ;;  %v398_v36 = vld [vmem:[#allocation7 + $0x3e0] sm:$0xff]  ;;  %v1236_v39 = vpack.c.bf16 %v391_v30, %v388_v29  ;;  %v1348_v30 = vpack.c.bf16 %v417_v26, %v414_v25  ;;  %v786_v26 = vld [vmem:[#allocation8 + $0x90] sm:$0xff] }
 0x126   :  { %v194_v47 = vpop.f32.mrb[0].mxu0 }
 0x127   :  { %v195_v51 = vadd.f32 %v194_v47, %v94_v45  ;;  %v196_v52 = vpop.f32.mrb[1].mxu0  ;;  %v394_v45 = vld [vmem:[#allocation7 + $0x3c0] sm:$0xff]  ;;  %v1238_v47 = vpack.c.bf16 %v398_v36, %v395_v35  ;;  %v428_v35 = vld [vmem:[#allocation7 + $0x4d0] sm:$0xff] }
 0x128   :  { %v197_v56 = vadd.f32 %v196_v52, %v98_v46  ;;  %v397_v46 = vld [vmem:[#allocation7 + $0x3d8] sm:$0xff]  ;;  %v404_v52 = vld [vmem:[#allocation7 + $0x410] sm:$0xff]  ;;  %v1258_v38 = vpack.c.bf16 %v428_v35, %v425_v34  ;;  %v772_v34 = vld [vmem:[#allocation8 + $0x20] sm:$0xff] }
 0x129   :  { %v1681_v60 = vpop.f32.mrb[0].mxu1  ;;  %v270_v5 = vmax.f32 %v195_v51, 0.0  ;;  %v401_v51 = vld [vmem:[#allocation7 + $0x3f8] sm:$0xff]  ;;  %v1240_v55 = vpack.c.bf16 %v397_v46, %v394_v45  ;;  %v434_v45 = vld [vmem:[#allocation7 + $0x500] sm:$0xff]  ;;  %v773_v35 = vld [vmem:[#allocation8 + $0x28] sm:$0xff] }
 0x12a   :  { %v267_v61 = vpop.f32.mrb[1].mxu1  ;;  %v271_v62 = vmax.f32 %v197_v56, 0.0  ;;  %v1242_v59 = vpack.c.bf16 %v404_v52, %v401_v51  ;;  %v440_v51 = vld [vmem:[#allocation7 + $0x530] sm:$0xff] }
 0x12b   :  { %v268_v4 = vadd.f32 %v267_v61, %v106_v50  ;;  %v399_v50 = vld [vmem:[#allocation7 + $0x3e8] sm:$0xff]  ;;  %v1338_v61 = vpack.c.bf16 %v453_v54, %v450_v53  ;;  %v436_v54 = vld [vmem:[#allocation7 + $0x510] sm:$0xff] }
 0x12c   :  { %547 = vmatprep.mubr.f32.mxu0 %v271_v62  ;;  %689 = vmatprep.mubr.f32.mxu1 %v271_v62  ;;  %v1336_v56 = vpack.c.bf16 %v399_v50, %v396_v49  ;;  %v402_v62 = vld [vmem:[#allocation7 + $0x400] sm:$0xff]  ;;  %v433_v49 = vld [vmem:[#allocation7 + $0x4f8] sm:$0xff] }
 0x12d   :  { %v273_v14 = vmax.f32 %v268_v4, 0.0  ;;  %548 = vmatmul.mubr.f32.vlgmr.msra.gmra.mrb[2].mxu0 %v270_v5  ;;  %690 = vmatmul.mubr.f32.vlgmr.msra.gmra.mrb[2].mxu1 %v270_v5  ;;  %v459_v4 = vld [vmem:[#allocation7 + $0x5c8] sm:$0xff]  ;;  %v101_v5 = vsub.s32 2, %v1664_v40  ;;  %v437_v50 = vld [vmem:[#allocation7 + $0x518] sm:$0xff]  ;;  %v804_v40 = vld [vmem:[#allocation8 + $0x120] sm:$0xff] }
 0x12e   :  { %1225 = vmatpush1.bf16.msra.mxu0 %v1224_v63  ;;  %1321 = vmatpush3.bf16.msra.mxu1 %v1320_v1  ;;  %v405_v63 = vld [vmem:[#allocation7 + $0x418] sm:$0xff]  ;;  %v407_v1 = vld [vmem:[#allocation7 + $0x428] sm:$0xff]  ;;  %v1342_v11 = vpack.c.bf16 %v459_v4, %v456_v3  ;;  %v1266_v53 = vpack.c.bf16 %v440_v51, %v437_v50  ;;  %v448_v4 = vld [vmem:[#allocation7 + $0x570] sm:$0xff] }
 0x12f   :  { %1227 = vmatprep.subr.bf16.mxu0 %v1226_v6  ;;  %1323 = vmatprep.subr.bf16.mxu1 %v1322_v7  ;;  %v1244_v6 = vpack.c.bf16 %v403_v58, %v400_v57  ;;  %v1340_v7 = vpack.c.bf16 %v405_v63, %v402_v62  ;;  %v1246_v10 = vpack.c.bf16 %v410_v2, %v407_v1  ;;  %v446_v57 = vld [vmem:[#allocation7 + $0x560] sm:$0xff]  ;;  %v445_v62 = vld [vmem:[#allocation7 + $0x558] sm:$0xff]  ;;  %v452_v1 = vld [vmem:[#allocation7 + $0x590] sm:$0xff] }
 0x130   :  { %759 = vmatprep.mubr.f32.mxu1 %v273_v14  ;;  %618 = vmatprep.mubr.f32.mxu0 %v273_v14  ;;  %v413_v14 = vld [vmem:[#allocation7 + $0x458] sm:$0xff]  ;;  %v102_v18 = vrot.slane %v1670_v42, %v101_v5  ;;  %v1252_v42 = vpack.c.bf16 %v415_v24, %v412_v21  ;;  %v785_v21 = vld [vmem:[#allocation8 + $0x88] sm:$0xff]  ;;  %v794_v51 = vld [vmem:[#allocation8 + $0xd0] sm:$0xff] }
 0x131   :  { %v449_v63 = vld [vmem:[#allocation7 + $0x578] sm:$0xff]  ;;  %v769_v24 = vld [vmem:[#allocation8 + $0x8] sm:$0xff] }
 0x132   :  { %1229 = vmatpush1.bf16.msra.mxu0 %v1228_v15  ;;  %1325 = vmatpush3.bf16.msra.mxu1 %v1324_v16  ;;  %v416_v15 = vld [vmem:[#allocation7 + $0x470] sm:$0xff]  ;;  %v462_v16 = vld [vmem:[#allocation7 + $0x5e0] sm:$0xff]  ;;  %v1688_v29 = vadd.f32 %v1681_v60, %v102_v18  ;;  %v1274_v3 = vpack.c.bf16 %v452_v1, %v449_v63  ;;  %v463_v18 = vld [vmem:[#allocation7 + $0x5e8] sm:$0xff] }
 0x133   :  { %1231 = vmatprep.subr.bf16.mxu0 %v1230_v19  ;;  %1327 = vmatprep.subr.bf16.mxu1 %v1326_v20  ;;  %v1248_v19 = vpack.c.bf16 %v409_v9, %v406_v8  ;;  %v1344_v20 = vpack.c.bf16 %v411_v13, %v408_v12  ;;  %v1250_v22 = vpack.c.bf16 %v416_v15, %v413_v14  ;;  %v424_v60 = vld [vmem:[#allocation7 + $0x4b0] sm:$0xff]  ;;  %v458_v8 = vld [vmem:[#allocation7 + $0x5c0] sm:$0xff]  ;;  %v457_v12 = vld [vmem:[#allocation7 + $0x5b8] sm:$0xff] }
 0x134   :  { %v1346_v23 = vpack.c.bf16 %v465_v17, %v462_v16  ;;  %v272_v36 = vmax.f32 %v1688_v29, 0.0  ;;  %v461_v13 = vld [vmem:[#allocation7 + $0x5d8] sm:$0xff]  ;;  %v464_v14 = vld [vmem:[#allocation7 + $0x5f0] sm:$0xff]  ;;  %v777_v50 = vld [vmem:[#allocation8 + $0x48] sm:$0xff] }
 0x135   :  { %v1282_v16 = vpack.c.bf16 %v464_v14, %v461_v13  ;;  %v460_v17 = vld [vmem:[#allocation7 + $0x5d0] sm:$0xff]  ;;  %v781_v63 = vld [vmem:[#allocation8 + $0x68] sm:$0xff]  ;;  %v466_v13 = vld [vmem:[%s1720_s4] sm:$0x7] }
 0x136   :  { %1233 = vmatpush1.bf16.msra.mxu0 %v1232_v27  ;;  %1329 = vmatpush3.bf16.msra.mxu1 %v1328_v28  ;;  %v419_v27 = vld [vmem:[#allocation7 + $0x488] sm:$0xff]  ;;  %v422_v28 = vld [vmem:[#allocation7 + $0x4a0] sm:$0xff]  ;;  %v479_v14 = vrot.slane %v466_v13, %v101_v5 }
 0x137   :  { %1235 = vmatprep.subr.bf16.mxu0 %v1234_v31  ;;  %1331 = vmatprep.subr.bf16.mxu1 %v1330_v32  ;;  %v1254_v31 = vpack.c.bf16 %v422_v28, %v419_v27  ;;  %v418_v32 = vld [vmem:[#allocation7 + $0x480] sm:$0xff]  ;;  %v787_v27 = vld [vmem:[#allocation8 + $0x98] sm:$0xff]  ;;  %v770_v28 = vld [vmem:[#allocation8 + $0x10] sm:$0xff] }
 0x138   :  { %v1256_v37 = vpack.c.bf16 %v421_v33, %v418_v32  ;;  %v1354_v29 = vpack.c.bf16 %v787_v27, %v786_v26  ;;  %v801_v26 = vld [vmem:[#allocation8 + $0x108] sm:$0xff] }
 0x13a   :  { %1237 = vmatpush1.bf16.msra.mxu0 %v1236_v39  ;;  %1333 = vmatpush3.bf16.msra.mxu1 %v1332_v44  ;;  %v427_v39 = vld [vmem:[#allocation7 + $0x4c8] sm:$0xff] }
 0x13b   :  { %1239 = vmatprep.subr.bf16.mxu0 %v1238_v47  ;;  %1335 = vmatprep.subr.bf16.mxu1 %v1334_v48  ;;  %v431_v44 = vld [vmem:[#allocation7 + $0x4e8] sm:$0xff]  ;;  %v1260_v46 = vpack.c.bf16 %v427_v39, %v424_v60  ;;  %v430_v48 = vld [vmem:[#allocation7 + $0x4e0] sm:$0xff]  ;;  %v774_v39 = vld [vmem:[#allocation8 + $0x30] sm:$0xff] }
 0x13c   :  { %v1262_v47 = vpack.c.bf16 %v434_v45, %v431_v44  ;;  %v1264_v52 = vpack.c.bf16 %v433_v49, %v430_v48  ;;  %v775_v44 = vld [vmem:[#allocation8 + $0x38] sm:$0xff]  ;;  %v792_v45 = vld [vmem:[#allocation8 + $0xc0] sm:$0xff] }
 0x13d   :  { %v776_v49 = vld [vmem:[#allocation8 + $0x40] sm:$0xff] }
 0x13e   :  { %1241 = vmatpush1.bf16.msra.mxu0 %v1240_v55  ;;  %1337 = vmatpush3.bf16.msra.mxu1 %v1336_v56  ;;  %v439_v55 = vld [vmem:[#allocation7 + $0x528] sm:$0xff] }
 0x13f   :  { %1243 = vmatprep.subr.bf16.mxu0 %v1242_v59  ;;  %1339 = vmatprep.subr.bf16.mxu1 %v1338_v61  ;;  %v443_v56 = vld [vmem:[#allocation7 + $0x548] sm:$0xff]  ;;  %v1268_v58 = vpack.c.bf16 %v439_v55, %v436_v54  ;;  %v442_v61 = vld [vmem:[#allocation7 + $0x540] sm:$0xff]  ;;  %v778_v55 = vld [vmem:[#allocation8 + $0x50] sm:$0xff] }
 0x140   :  { %v1270_v59 = vpack.c.bf16 %v446_v57, %v443_v56  ;;  %v1272_v2 = vpack.c.bf16 %v445_v62, %v442_v61  ;;  %v779_v56 = vld [vmem:[#allocation8 + $0x58] sm:$0xff]  ;;  %v796_v57 = vld [vmem:[#allocation8 + $0xe0] sm:$0xff] }
 0x141   :  { %v780_v62 = vld [vmem:[#allocation8 + $0x60] sm:$0xff] }
 0x142   :  { %1245 = vmatpush1.bf16.msra.mxu0 %v1244_v6  ;;  %1341 = vmatpush3.bf16.msra.mxu1 %v1340_v7  ;;  %v451_v6 = vld [vmem:[#allocation7 + $0x588] sm:$0xff]  ;;  %v1376_v1 = vpack.c.bf16 %v781_v63, %v780_v62 }
 0x143   :  { %1247 = vmatprep.subr.bf16.mxu0 %v1246_v10  ;;  %1343 = vmatprep.subr.bf16.mxu1 %v1342_v11  ;;  %v455_v7 = vld [vmem:[#allocation7 + $0x5a8] sm:$0xff]  ;;  %v1276_v9 = vpack.c.bf16 %v451_v6, %v448_v4  ;;  %v454_v11 = vld [vmem:[#allocation7 + $0x5a0] sm:$0xff]  ;;  %v782_v6 = vld [vmem:[#allocation8 + $0x70] sm:$0xff] }
 0x144   :  { %v1278_v10 = vpack.c.bf16 %v458_v8, %v455_v7  ;;  %v1280_v15 = vpack.c.bf16 %v457_v12, %v454_v11  ;;  %v783_v7 = vld [vmem:[#allocation8 + $0x78] sm:$0xff] }
 0x145   :  { %v1380_v8 = vpack.c.bf16 %v783_v7, %v782_v6 }
 0x146   :  { %1249 = vmatpush1.bf16.msra.mxu0 %v1248_v19  ;;  %1345 = vmatpush3.bf16.msra.mxu1 %v1344_v20  ;;  %v1284_v19 = vpack.c.bf16 %v463_v18, %v460_v17  ;;  %v784_v20 = vld [vmem:[#allocation8 + $0x80] sm:$0xff] }
 0x147   :  { %1251 = vmatprep.subr.bf16.mxu0 %v1250_v22  ;;  %1347 = vmatprep.subr.bf16.mxu1 %v1346_v23  ;;  %v1350_v22 = vpack.c.bf16 %v785_v21, %v784_v20  ;;  %v768_v23 = vld [vmem:[#allocation8] sm:$0xff]  ;;  %v471_v20 = vrot.slane %v466_v13, %v93_v41  ;;  %v475_v21 = vrot.slane %v466_v13, %v97_v43  ;;  %v805_v41 = vld [vmem:[#allocation8 + $0x128] sm:$0xff] }
 0x148   :  { %v1352_v25 = vpack.c.bf16 %v769_v24, %v768_v23  ;;  %v1389_v43 = vpack.c.bf16 %v805_v41, %v804_v40 }
 0x14a   :  { %1253 = vmatpush1.bf16.msra.mxu0 %v1252_v42  ;;  %1349 = vmatpush3.bf16.msra.mxu1 %v1348_v30  ;;  %v771_v42 = vld [vmem:[#allocation8 + $0x18] sm:$0xff]  ;;  %v788_v30 = vld [vmem:[#allocation8 + $0xa0] sm:$0xff] }
 0x14b   :  { %1255 = vmatprep.subr.bf16.mxu0 %v1254_v31  ;;  %1351 = vmatprep.subr.bf16.mxu1 %v1350_v22  ;;  %v789_v31 = vld [vmem:[#allocation8 + $0xa8] sm:$0xff]  ;;  %v1356_v32 = vpack.c.bf16 %v771_v42, %v770_v28  ;;  %v802_v42 = vld [vmem:[#allocation8 + $0x110] sm:$0xff] }
 0x14c   :  { %v1358_v33 = vpack.c.bf16 %v789_v31, %v788_v30  ;;  %v803_v30 = vld [vmem:[#allocation8 + $0x118] sm:$0xff] }
 0x14d   :  { %760 = vmatmul.mubr.f32.vlgmr.msra.gmra.mrb[4].mxu1 %v272_v36  ;;  %v1386_v31 = vpack.c.bf16 %v803_v30, %v802_v42 }
 0x14e   :  { %1257 = vmatpush1.bf16.msra.mxu0 %v1256_v37  ;;  %1353 = vmatpush3.bf16.msra.mxu1 %v1352_v25  ;;  %v791_v37 = vld [vmem:[#allocation8 + $0xb8] sm:$0xff]  ;;  %v800_v25 = vld [vmem:[#allocation8 + $0x100] sm:$0xff] }
 0x14f   :  { %1259 = vmatprep.subr.bf16.mxu0 %v1258_v38  ;;  %1355 = vmatprep.subr.bf16.mxu1 %v1354_v29  ;;  %v1360_v38 = vpack.c.bf16 %v773_v35, %v772_v34  ;;  %v1383_v29 = vpack.c.bf16 %v801_v26, %v800_v25  ;;  %v808_v35 = vld [vmem:[#allocation8 + $0x140] sm:$0xff] }
 0x152   :  { %1261 = vmatpush1.bf16.msra.mxu0 %v1260_v46  ;;  %1357 = vmatpush3.bf16.msra.mxu1 %v1356_v32  ;;  %v793_v46 = vld [vmem:[#allocation8 + $0xc8] sm:$0xff]  ;;  %v806_v32 = vld [vmem:[#allocation8 + $0x130] sm:$0xff] }
 0x153   :  { %1263 = vmatprep.subr.bf16.mxu0 %v1262_v47  ;;  %1359 = vmatprep.subr.bf16.mxu1 %v1358_v33  ;;  %v1364_v47 = vpack.c.bf16 %v775_v44, %v774_v39  ;;  %v1366_v48 = vpack.c.bf16 %v793_v46, %v792_v45  ;;  %v807_v33 = vld [vmem:[#allocation8 + $0x138] sm:$0xff]  ;;  %v812_v39 = vld [vmem:[#allocation8 + $0x160] sm:$0xff]  ;;  %v813_v44 = vld [vmem:[#allocation8 + $0x168] sm:$0xff] }
 0x154   :  { %v1392_v34 = vpack.c.bf16 %v807_v33, %v806_v32  ;;  %v1401_v45 = vpack.c.bf16 %v813_v44, %v812_v39  ;;  %v814_v46 = vld [vmem:[#allocation8 + $0x170] sm:$0xff] }
 0x156   :  { %1265 = vmatpush1.bf16.msra.mxu0 %v1264_v52  ;;  %1361 = vmatpush3.bf16.msra.mxu1 %v1360_v38  ;;  %v795_v52 = vld [vmem:[#allocation8 + $0xd8] sm:$0xff]  ;;  %v810_v38 = vld [vmem:[#allocation8 + $0x150] sm:$0xff] }
 0x157   :  { %1267 = vmatprep.subr.bf16.mxu0 %v1266_v53  ;;  %v1368_v53 = vpack.c.bf16 %v777_v50, %v776_v49  ;;  %v1370_v54 = vpack.c.bf16 %v795_v52, %v794_v51 }
 0x15a   :  { %1269 = vmatpush1.bf16.msra.mxu0 %v1268_v58  ;;  %v797_v58 = vld [vmem:[#allocation8 + $0xe8] sm:$0xff] }
 0x15b   :  { %1271 = vmatprep.subr.bf16.mxu0 %v1270_v59  ;;  %v1372_v59 = vpack.c.bf16 %v779_v56, %v778_v55  ;;  %v1374_v61 = vpack.c.bf16 %v797_v58, %v796_v57 }
 0x15e   :  { %1273 = vmatpush1.bf16.msra.mxu0 %v1272_v2  ;;  %v798_v2 = vld [vmem:[#allocation8 + $0xf0] sm:$0xff] }
 0x15f   :  { %1275 = vmatprep.subr.bf16.mxu0 %v1274_v3  ;;  %v799_v3 = vld [vmem:[#allocation8 + $0xf8] sm:$0xff] }
 0x160   :  { %v1378_v4 = vpack.c.bf16 %v799_v3, %v798_v2 }
 0x162   :  { %1277 = vmatpush1.bf16.msra.mxu0 %v1276_v9  ;;  %v1557_v9 = vmov 0.0|0.0  }
 0x163   :  { %1279 = vmatprep.subr.bf16.mxu0 %v1278_v10 }
 0x166   :  { %1281 = vmatpush1.bf16.msra.mxu0 %v1280_v15 }
 0x167   :  { %1283 = vmatprep.subr.bf16.mxu0 %v1282_v16 }
 0x16a   :  { %1285 = vmatpush1.bf16.msra.mxu0 %v1284_v19 }
 0x16d   :  { %619 = vmatmul.mubr.f32.vlgmr.msra.gmra.mrb[2].mxu0 %v272_v36  ;;  %v790_v36 = vld [vmem:[#allocation8 + $0xb0] sm:$0xff] }
 0x16e   :  { %v1362_v60 = vpack.c.bf16 %v791_v37, %v790_v36  ;;  %v809_v36 = vld [vmem:[#allocation8 + $0x148] sm:$0xff] }
 0x16f   :  { %v1395_v37 = vpack.c.bf16 %v809_v36, %v808_v35 }
 0x170   :  { %1363 = vmatprep.subr.bf16.mxu1 %v1362_v60  ;;  %v811_v60 = vld [vmem:[#allocation8 + $0x158] sm:$0xff] }
 0x171   :  { %1365 = vmatpush3.bf16.msra.mxu1 %v1364_v47  ;;  %v815_v47 = vld [vmem:[#allocation8 + $0x178] sm:$0xff] }
 0x172   :  { %1367 = vmatprep.subr.bf16.mxu1 %v1366_v48  ;;  %v1404_v48 = vpack.c.bf16 %v815_v47, %v814_v46 }
 0x175   :  { %1369 = vmatpush3.bf16.msra.mxu1 %v1368_v53  ;;  %v988_v53 = vld [vmem:[%s1722_s6] ss:$0 sm:$0xff] }
 0x176   :  { %1371 = vmatprep.subr.bf16.mxu1 %v1370_v54 }
 0x179   :  { %1373 = vmatpush3.bf16.msra.mxu1 %v1372_v59 }
 0x17a   :  { %1375 = vmatprep.subr.bf16.mxu1 %v1374_v61 }
 0x17d   :  { %1377 = vmatpush3.bf16.msra.mxu1 %v1376_v1 }
 0x17e   :  { %1379 = vmatprep.subr.bf16.mxu1 %v1378_v4 }
 0x181   :  { %1381 = vmatpush3.bf16.msra.mxu1 %v1380_v8 }
 0x182   :  { %1382 = vmatprep.subr.bf16.mxu1 %v1557_v9 }
 0x200   :  { %v1021_v10 = vpop.f32.mrb[2].mxu1 }
 0x201   :  { %v1022_v11 = vpop.f32.mrb[3].mxu1 }
 0x202   :  { %v1023_v12 = vadd.f32 %v1022_v11, %v1021_v10 }
 0x204   :  { %v692_v17 = vadd.f32 %v1023_v12, %v479_v14 }
 0x220   :  { %v1056_v15 = vpop.f32.mrb[4].mxu1 }
 0x221   :  { %v1057_v16 = vpop.f32.mrb[5].mxu1 }
 0x222   :  { %v1058_v18 = vadd.f32 %v1057_v16, %v1056_v15 }
 0x224   :  { %v762_v19 = vadd.f32 %v1058_v18, %v692_v17 }
 0x226   :  { %v767_v49 = vmax.f32 %v762_v19, 0.0 }
 0x240   :  { %v620_v22 = vpop.f32.mrb[2].mxu0 }
 0x241   :  { %v1406_v23 = vadd.f32 %v620_v22, %v471_v20  ;;  %v622_v24 = vpop.f32.mrb[3].mxu0 }
 0x242   :  { %v1407_v27 = vadd.f32 %v622_v24, %v475_v21 }
 0x243   :  { %v765_v5 = vmax.f32 %v1406_v23, 0.0 }
 0x244   :  { %v766_v28 = vmax.f32 %v1407_v27, 0.0 }
 0x246   :  { %887 = vmatprep.mubr.f32.mxu1 %v766_v28 }
 0x247   :  { %888 = vmatmul.mubr.f32.vlgmr.msra.gmra.mrb[6].mxu1 %v765_v5 }
 0x248   :  { %1384 = vmatpush3.bf16.msra.mxu1 %v1383_v29  ;;  %1143 = vmatprep.mubr.msk.f32.mxu1 %vm1558_vm4, %v1555_v0  ;;  %v1398_v0 = vpack.c.bf16 %v811_v60, %v810_v38 }
 0x249   :  { %1385 = vmatprep.subr.bf16.mxu1 %v1557_v9 }
 0x24c   :  { %1387 = vmatpush3.bf16.msra.mxu1 %v1386_v31 }
 0x24d   :  { %1388 = vmatprep.subr.bf16.mxu1 %v1557_v9 }
 0x250   :  { %1390 = vmatpush3.bf16.msra.mxu1 %v1389_v43 }
 0x251   :  { %1391 = vmatprep.subr.bf16.mxu1 %v1557_v9 }
 0x254   :  { %1393 = vmatpush3.bf16.msra.mxu1 %v1392_v34 }
 0x255   :  { %1394 = vmatprep.subr.bf16.mxu1 %v1557_v9 }
 0x258   :  { %1396 = vmatpush3.bf16.msra.mxu1 %v1395_v37 }
 0x259   :  { %1397 = vmatprep.subr.bf16.mxu1 %v1557_v9 }
 0x25c   :  { %1399 = vmatpush3.bf16.msra.mxu1 %v1398_v0 }
 0x25d   :  { %1400 = vmatprep.subr.bf16.mxu1 %v1557_v9 }
 0x260   :  { %1402 = vmatpush3.bf16.msra.mxu1 %v1401_v45 }
 0x261   :  { %1403 = vmatprep.subr.bf16.mxu1 %v1557_v9 }
 0x264   :  { %1405 = vmatpush3.bf16.msra.mxu1 %v1404_v48 }
 0x267   :  { %1144 = vmatmul.mubr.f32.vlgmr.msra.gmra.mrb[8].mxu1 %v767_v49 }
 0x31a   :  { %v1091_v50 = vpop.f32.mrb[6].mxu1 }
 0x31b   :  { %v1092_v51 = vpop.f32.mrb[7].mxu1 }
 0x31c   :  { %v1093_v52 = vadd.f32 %v1092_v51, %v1091_v50 }
 0x31e   :  { %v890_v54 = vadd.f32 %v1093_v52, %v988_v53 }
 0x33a   :  { %v959_v55 = vpop.f32.mrb[8].mxu1 }
 0x33b   :  { %v960_v56 = vadd.f32 %v959_v55, %v890_v54  ;;  %v1145_v57 = vpop.f32.mrb[9].mxu1 }
 0x33d   :  { %1425 = vtanh.f32 %v960_v56 }
 0x347   :  { %v1426_v58 = vpop.eup %1425 }
 0x348   :  { %964 = vst [vmem:[#allocation10] sm:$0xff] %v1426_v58 }
 0x349   :  { %1526 = shalt.err (!%p1523_p8)
}
 0x34a   :  { %s1527_s6 = scalar_lea.hbm %s1723_s7, 128 }
 0x34b   :  { %p1528_p9 = scmp.ne.s32.totalorder %s1723_s7, %s1527_s6  ;;  %p1531_p10 = scmp.lt.u32.totalorder %s1527_s6, %s1723_s7 }
 0x34d   :  { %p1533_p11 = pnand %p1531_p10, %p1528_p9 }
 0x34f   :  { %1536 = shalt.err (!%p1533_p11)
}
 0x350   :  { %974 = dma.vmem_to_hbm [thread:$0]  %s972_s9, 128, %s1723_s7, [#allocation4]  }
 0x351   :  { %1543 = dma.done.wait [#allocation4], 128  }
 0x352   :  { %1544 = vsyncadd [#allocation4], 4294967168 }
 0x353   :  { %978 = vsyncpa [#allocation3], 1 }
 0x354   :  { %979 = vsyncpa [#allocation6], 1 }
 0x355   :  { %980 = vsyncpa [#allocation9], 1 }
 0x356   :  { %981 = vsyncpa [#allocation4], 1 }

</bundles_post_ra>
